<compile_context>
chip_gen: v5e
topology: v5e:2x2
jax: 0.10.0
libtpu: 0.0.40
codegen_flags: <defaults>
</compile_context>

<pallas_src>
import functools

import jax
import jax.numpy as jnp
import numpy as np
from jax import lax
from jax.experimental import pallas as pl
from jax.experimental.pallas import tpu as pltpu


def _norm_rows_kernel(x_ref, w_ref, b_ref, o_ref, *, eps):
    """Normalize x_ref (rows, E) over the row axis; affine with w/b of shape (1, E)."""
    x = x_ref[...]                                   # (rows, E) float32
    n = x.shape[0]
    inv_n = jnp.float32(1.0 / n)
    mean = jnp.sum(x, axis=0, keepdims=True) * inv_n             # (1, E)
    centered = x - mean
    var = jnp.sum(centered * centered, axis=0, keepdims=True) * inv_n
    inv_std = lax.rsqrt(var + jnp.float32(eps))                  # EUP rsqrt
    scale = inv_std * w_ref[...]                                  # (1, E)
    o_ref[...] = centered * scale + b_ref[...]                    # single write


def batch_normalization(x, weight, bias, *, eps=1e-5):
    """nn.BatchNorm1d(E, affine=True) training-mode forward on x of shape (B, G, E)."""
    B, G, E = x.shape
    N = B * G
    xf = x.reshape(N, E).astype(jnp.float32)
    w = weight.reshape(1, E).astype(jnp.float32)
    b = bias.reshape(1, E).astype(jnp.float32)

    out = pl.pallas_call(
        functools.partial(_norm_rows_kernel, eps=eps),
        out_shape=jax.ShapeDtypeStruct((N, E), jnp.float32),
        grid=(1,),
        in_specs=[
            pl.BlockSpec((N, E), lambda i: (0, 0)),
            pl.BlockSpec((1, E), lambda i: (0, 0)),
            pl.BlockSpec((1, E), lambda i: (0, 0)),
        ],
        out_specs=pl.BlockSpec((N, E), lambda i: (0, 0)),
        compiler_params=pltpu.CompilerParams(
            dimension_semantics=("arbitrary",)),
    )(xf, w, b)
    return out.reshape(B, G, E)


def instance_normalization(x, weight, bias, *, eps=1e-5):
    """nn.InstanceNorm1d(E, affine=True) forward, matching the module's permute(0,2,1) usage."""
    B, G, E = x.shape
    xf = x.astype(jnp.float32)
    w = weight.reshape(1, E).astype(jnp.float32)
    b = bias.reshape(1, E).astype(jnp.float32)

    out = pl.pallas_call(
        functools.partial(_norm_rows_kernel, eps=eps),
        out_shape=jax.ShapeDtypeStruct((B, G, E), jnp.float32),
        grid=(B,),
        in_specs=[
            pl.BlockSpec((None, G, E), lambda bb: (bb, 0, 0)),
            pl.BlockSpec((1, E), lambda bb: (0, 0)),
            pl.BlockSpec((1, E), lambda bb: (0, 0)),
        ],
        out_specs=pl.BlockSpec((None, G, E), lambda bb: (bb, 0, 0)),
        compiler_params=pltpu.CompilerParams(
            dimension_semantics=("parallel",)),
    )(xf, w, b)
    return out


def normalization_forward(x, weight, bias, normalization="batch", *, eps=1e-5):
    """Mirror of Normalization.forward."""
    if normalization == "batch":
        return batch_normalization(x, weight, bias, eps=eps)
    elif normalization == "instance":
        return instance_normalization(x, weight, bias, eps=eps)
    else:
        return x


# ------------------------- pure-JAX references (mirror the PyTorch code) -----------------
def batch_norm_reference(x, weight, bias, eps=1e-5):
    B, G, E = x.shape
    xf = x.reshape(-1, E)
    mean = xf.mean(axis=0)
    var = xf.var(axis=0)                 # biased variance (PyTorch BN normalization)
    y = (xf - mean) / jnp.sqrt(var + eps) * weight + bias
    return y.reshape(B, G, E)


def instance_norm_reference(x, weight, bias, eps=1e-5):
    mean = x.mean(axis=1, keepdims=True)
    var = x.var(axis=1, keepdims=True)   # biased variance (PyTorch IN)
    return (x - mean) / jnp.sqrt(var + eps) * weight + bias


if __name__ == "__main__":
    key = jax.random.PRNGKey(0)
    batch, graph_size, embed_dim = 2, 8, 32

    x = jax.random.normal(jax.random.fold_in(key, 0),
                          (batch, graph_size, embed_dim), jnp.float32)
    # init_parameters(): uniform(-stdv, stdv) with stdv = 1/sqrt(param.size(-1))
    stdv = 1.0 / np.sqrt(embed_dim)
    weight = jax.random.uniform(jax.random.fold_in(key, 1), (embed_dim,),
                                jnp.float32, -stdv, stdv)
    bias = jax.random.uniform(jax.random.fold_in(key, 2), (embed_dim,),
                              jnp.float32, -stdv, stdv)

    # Default path: 'batch'
    out_bn = normalization_forward(x, weight, bias, normalization="batch")
    out_bn = jax.block_until_ready(out_bn)
    ref_bn = batch_norm_reference(x, weight, bias)
    np.testing.assert_allclose(np.asarray(out_bn), np.asarray(ref_bn),
                               rtol=1e-4, atol=1e-4)
    assert out_bn.shape == (batch, graph_size, embed_dim)
    assert not bool(jnp.any(jnp.isnan(out_bn)))

    # 'instance' path
    out_in = normalization_forward(x, weight, bias, normalization="instance")
    out_in = jax.block_until_ready(out_in)
    ref_in = instance_norm_reference(x, weight, bias)
    np.testing.assert_allclose(np.asarray(out_in), np.asarray(ref_in),
                               rtol=1e-4, atol=1e-4)
    assert out_in.shape == (batch, graph_size, embed_dim)
    assert not bool(jnp.any(jnp.isnan(out_in)))

    print("KERNEL_OK")
</pallas_src>

<mosaic_0001>
module attributes {stable_mosaic.version = 11 : i64} {
  func.func @_norm_rows_kernel(%arg0: i32, %arg1: memref<16x32xf32, #tpu.memory_space<vmem>>, %arg2: memref<1x32xf32, #tpu.memory_space<vmem>>, %arg3: memref<1x32xf32, #tpu.memory_space<vmem>>, %arg4: memref<16x32xf32, #tpu.memory_space<vmem>>) attributes {dimension_semantics = [#tpu.dimension_semantics<arbitrary>], iteration_bounds = array<i64: 1>, scalar_prefetch = 0 : i64, scratch_operands = 0 : i64, tpu.core_type = #tpu.core_type<tc>, window_params = [{pipeline_mode = #tpu.pipeline_mode<synchronous>, transform_indices = @transform_0, window_bounds = array<i64: 16, 32>}, {pipeline_mode = #tpu.pipeline_mode<synchronous>, transform_indices = @transform_1, window_bounds = array<i64: 1, 32>}, {pipeline_mode = #tpu.pipeline_mode<synchronous>, transform_indices = @transform_2, window_bounds = array<i64: 1, 32>}, {pipeline_mode = #tpu.pipeline_mode<synchronous>, transform_indices = @transform_3, window_bounds = array<i64: 16, 32>}]} {
    %c0 = arith.constant 0 : index
    %c0_0 = arith.constant 0 : index
    %0 = vector.load %arg1[%c0, %c0_0] : memref<16x32xf32, #tpu.memory_space<vmem>>, vector<16x32xf32>
    %cst = arith.constant dense<0.000000e+00> : vector<32xf32>
    %1 = vector.multi_reduction <add>, %0, %cst [0] : vector<16x32xf32> to vector<32xf32>
    %2 = vector.shape_cast %1 : vector<32xf32> to vector<1x32xf32>
    %cst_1 = arith.constant 6.250000e-02 : f32
    %3 = vector.broadcast %cst_1 : f32 to vector<1x32xf32>
    %4 = arith.mulf %2, %3 : vector<1x32xf32>
    %5 = vector.broadcast %4 : vector<1x32xf32> to vector<16x32xf32>
    %6 = arith.subf %0, %5 : vector<16x32xf32>
    %7 = arith.mulf %6, %6 : vector<16x32xf32>
    %cst_2 = arith.constant dense<0.000000e+00> : vector<32xf32>
    %8 = vector.multi_reduction <add>, %7, %cst_2 [0] : vector<16x32xf32> to vector<32xf32>
    %9 = vector.shape_cast %8 : vector<32xf32> to vector<1x32xf32>
    %cst_3 = arith.constant 6.250000e-02 : f32
    %10 = vector.broadcast %cst_3 : f32 to vector<1x32xf32>
    %11 = arith.mulf %9, %10 : vector<1x32xf32>
    %cst_4 = arith.constant 9.99999974E-6 : f32
    %12 = vector.broadcast %cst_4 : f32 to vector<1x32xf32>
    %13 = arith.addf %11, %12 : vector<1x32xf32>
    %14 = math.rsqrt %13 : vector<1x32xf32>
    %c0_5 = arith.constant 0 : index
    %c0_6 = arith.constant 0 : index
    %15 = vector.load %arg2[%c0_5, %c0_6] : memref<1x32xf32, #tpu.memory_space<vmem>>, vector<1x32xf32>
    %16 = arith.mulf %14, %15 : vector<1x32xf32>
    %17 = vector.broadcast %16 : vector<1x32xf32> to vector<16x32xf32>
    %18 = arith.mulf %6, %17 : vector<16x32xf32>
    %c0_7 = arith.constant 0 : index
    %c0_8 = arith.constant 0 : index
    %19 = vector.load %arg3[%c0_7, %c0_8] : memref<1x32xf32, #tpu.memory_space<vmem>>, vector<1x32xf32>
    %20 = vector.broadcast %19 : vector<1x32xf32> to vector<16x32xf32>
    %21 = arith.addf %18, %20 : vector<16x32xf32>
    %c0_9 = arith.constant 0 : index
    %c0_10 = arith.constant 0 : index
    %22 = vector.load %arg4[%c0_9, %c0_10] : memref<16x32xf32, #tpu.memory_space<vmem>>, vector<16x32xf32>
    tpu.vector_store %arg4[%c0_9, %c0_10], %21 {strides = array<i32>} : memref<16x32xf32, #tpu.memory_space<vmem>>, vector<16x32xf32>,
    return
  }
  func.func @transform_0(%arg0: i32) -> (i32, i32) {
    %c0_i32 = arith.constant 0 : i32
    %c0_i32_0 = arith.constant 0 : i32
    %c0_i32_1 = arith.constant 0 : i32
    return %c0_i32, %c0_i32_0 : i32, i32
  }
  func.func @transform_1(%arg0: i32) -> (i32, i32) {
    %c0_i32 = arith.constant 0 : i32
    %c0_i32_0 = arith.constant 0 : i32
    %c0_i32_1 = arith.constant 0 : i32
    return %c0_i32, %c0_i32_0 : i32, i32
  }
  func.func @transform_2(%arg0: i32) -> (i32, i32) {
    %c0_i32 = arith.constant 0 : i32
    %c0_i32_0 = arith.constant 0 : i32
    %c0_i32_1 = arith.constant 0 : i32
    return %c0_i32, %c0_i32_0 : i32, i32
  }
  func.func @transform_3(%arg0: i32) -> (i32, i32) {
    %c0_i32 = arith.constant 0 : i32
    %c0_i32_0 = arith.constant 0 : i32
    %c0_i32_1 = arith.constant 0 : i32
    return %c0_i32, %c0_i32_0 : i32, i32
  }
}

</mosaic_0001>

<bundles_post_ra>
// kernel: tpu_custom_call.1
= control target key start
LH: loop header
LB: loop body
LE: loop exit
PB: predicated region body
PF: predicated region fallthrough
CT: control target
= control target key end

     0   :  { %8 = vsyncpa [#allocation3], 0  ;;  %s251_s0 = inlined_call_operand.hbm [shape: f32[16,32], index: 0, kind: input, shape index: {}]   ;;  %s252_s1 = inlined_call_operand.hbm [shape: f32[1,32], index: 1, kind: input, shape index: {}]   ;;  %s253_s2 = inlined_call_operand.vmem [shape: f32[1,32], index: 2, kind: input, shape index: {}]   ;;  %s254_s3 = inlined_call_operand.hbm [shape: f32[16,32], index: 3, kind: output, shape index: {}]  }
   0x1   :  { %9 = vsyncpa [#allocation6], 0 }
   0x2   :  { %10 = vsyncpa [#allocation4], 0  ;;  %s15_s14 = sshll.u32 %s251_s0, 4  ;;  %s202_s15 = smov [#allocation2]   ;;  %s16_s14 = int_to_ptr.hbm [resolvable:$true] %s15_s14 }
   0x3   :  { %s17_s16 = sshll.u32 %s202_s15, 4  ;;  %s29_s19 = sshll.u32 %s252_s1, 4  ;;  %s18_s16 = int_to_ptr.vmem [resolvable:$true] %s17_s16  ;;  %s30_s19 = int_to_ptr.hbm [resolvable:$true] %s29_s19 }
   0x4   :  { %s203_s20 = smov 128   ;;  %s204_s21 = smov 8  }
   0x5   :  { %23 = dma.hbm_to_vmem [thread:$0]  %s16_s14, 256, %s18_s16, [#allocation3], %s203_s20, %s203_s20, %s204_s21  }
   0x6   :  { %s205_s22 = smov [#allocation5]  }
   0x7   :  { %s31_s23 = sshll.u32 %s205_s22, 4  ;;  %s32_s23 = int_to_ptr.vmem [resolvable:$true] %s31_s23 }
   0x8   :  { %34 = dma.hbm_to_vmem [thread:$0]  %s30_s19, 16, %s32_s23, [#allocation6]  }
   0x9   :  { %196 = dma.done.wait [#allocation3], 256  }
   0xa   :  { %197 = vsyncadd [#allocation3], 4294967040 }
   0xb   :  { %198 = dma.done.wait [#allocation6], 16  }
   0xc   :  { %199 = vsyncadd [#allocation6], 4294967280  ;;  %vm47_vm0 = vcmask 261120   ;;  %v45_v0 = vld [vmem:[#allocation2] sm:$0xff]  ;;  %v46_v1 = vld [vmem:[#allocation2 + $0x8] sm:$0xff]  ;;  %s206_s24 = smov [#allocation7]  }
   0xd   :  { %v48_v2 = vsel %vm47_vm0, %v45_v0, 0.0  ;;  %v49_v3 = vsel %vm47_vm0, %v46_v1, 0.0  ;;  %v83_v33 = vld [vmem:[#allocation5] sm:$0x1]  ;;  %v121_v37 = vld [vmem:[%s253_s2] ss:$0 sm:$0xff] }
   0xe   :  { %v50_v4 = vadd.f32 %v49_v3, %v48_v2  ;;  %s100_s25 = sshll.u32 %s206_s24, 4  ;;  %s102_s28 = sshll.u32 %s254_s3, 4  ;;  %s101_s25 = int_to_ptr.vmem [resolvable:$true] %s100_s25  ;;  %s103_s28 = int_to_ptr.hbm [resolvable:$true] %s102_s28 }
  0x10   :  { %v51_v5 = vrot.slane %v50_v4, 4 }
  0x12   :  { %v52_v6 = vadd.f32 %v51_v5, %v50_v4 }
  0x14   :  { %v53_v7 = vrot.slane %v52_v6, 2 }
  0x16   :  { %v54_v8 = vadd.f32 %v53_v7, %v52_v6 }
  0x18   :  { %v55_v9 = vrot.slane %v54_v8, 1 }
  0x1a   :  { %v56_v10 = vadd.f32 %v55_v9, %v54_v8 }
  0x1c   :  { %v57_v11 = vmul.f32 0.0625, %v56_v10 }
  0x1e   :  { %v58_v12 = vsub.f32 %v45_v0, %v57_v11  ;;  %v59_v13 = vsub.f32 %v46_v1, %v57_v11 }
  0x20   :  { %v60_v14 = vmul.f32 %v58_v12, %v58_v12  ;;  %v61_v15 = vmul.f32 %v59_v13, %v59_v13 }
  0x22   :  { %v62_v16 = vsel %vm47_vm0, %v60_v14, 0.0  ;;  %v63_v17 = vsel %vm47_vm0, %v61_v15, 0.0 }
  0x23   :  { %v64_v18 = vadd.f32 %v63_v17, %v62_v16 }
  0x25   :  { %v65_v19 = vrot.slane %v64_v18, 4 }
  0x27   :  { %v66_v20 = vadd.f32 %v65_v19, %v64_v18 }
  0x29   :  { %v67_v21 = vrot.slane %v66_v20, 2 }
  0x2b   :  { %v68_v22 = vadd.f32 %v67_v21, %v66_v20 }
  0x2d   :  { %v69_v23 = vrot.slane %v68_v22, 1 }
  0x2f   :  { %v70_v24 = vadd.f32 %v69_v23, %v68_v22 }
  0x31   :  { %v71_v25 = vmul.f32 0.0625, %v70_v24 }
  0x33   :  { %v72_v26 = vadd.f32 1e-05, %v71_v25 }
  0x35   :  { %122 = vrsqrt.f32 %v72_v26  ;;  %vm79_vm1 = vweird.f32 %v72_v26 }
  0x3b   :  { %v123_v27 = vpop.eup %122 }
  0x3c   :  { %v74_v28 = vmul.f32 %v123_v27, %v72_v26  ;;  %vm80_vm2 = vweird.f32 %v123_v27 }
  0x3d   :  { %vm81_vm3 = vmor %vm79_vm1, %vm80_vm2 }
  0x3e   :  { %v75_v29 = vmul.f32 %v123_v27, %v74_v28 }
  0x40   :  { %v76_v30 = vmul.f32 0.5, %v75_v29 }
  0x42   :  { %v77_v31 = vsub.f32 1.5, %v76_v30 }
  0x44   :  { %v78_v32 = vmul.f32 %v123_v27, %v77_v31 }
  0x46   :  { %v82_v34 = vsel %vm81_vm3, %v123_v27, %v78_v32 }
  0x47   :  { %v84_v35 = vmul.f32 %v83_v33, %v82_v34 }
  0x49   :  { %v85_v36 = vperm.slane %v84_v35, 0 }
  0x4b   :  { %v86_v38 = vmul.f32 %v85_v36, %v58_v12  ;;  %v87_v39 = vmul.f32 %v85_v36, %v59_v13 }
  0x4d   :  { %v92_v40 = vadd.f32 %v121_v37, %v86_v38  ;;  %v93_v41 = vadd.f32 %v121_v37, %v87_v39 }
  0x4f   :  { %94 = vst.msk [vmem:[#allocation7] sm:$0xff] %vm47_vm0, %v92_v40 }
  0x50   :  { %95 = vst.msk [vmem:[#allocation7 + $0x8] sm:$0xff] %vm47_vm0, %v93_v41 }
  0x51   :  { %108 = dma.vmem_to_hbm [thread:$0]  %s101_s25, 256, %s103_s28, [#allocation4], %s203_s20, %s203_s20, %s204_s21  }
  0x52   :  { %200 = dma.done.wait [#allocation4], 256  }
  0x53   :  { %201 = vsyncadd [#allocation4], 4294967040 }
  0x54   :  { %113 = vsyncpa [#allocation3], 1 }
  0x55   :  { %114 = vsyncpa [#allocation6], 1 }
  0x56   :  { %115 = vsyncpa [#allocation4], 1 }

</bundles_post_ra>
